<compile_context>
chip_gen: v7x
topology: tpu7x:2x2x1
jax: 0.10.0
libtpu: 0.0.40
codegen_flags: <defaults>
</compile_context>

<pallas_src>
import jax
import jax.numpy as jnp
from jax import lax
from jax.experimental import pallas as pl
from jax.experimental.pallas import tpu as pltpu


# Per-grid-step byte budget for (input block + output block), single-buffered.
# Double-buffering brings peak VMEM to ~2x this; with the 48 MiB scoped limit
# there is headroom for the tiny scale/shift blocks and internal scratch on
# every generation (v7x physical VMEM is 64 MiB per TensorCore).
_STEP_BYTES = 16 << 20
_VMEM_LIMIT_BYTES = 48 << 20


def _cdiv(a, b):
    return -(-a // b)


def _round_up(x, m):
    return ((x + m - 1) // m) * m


def _frozen_bn_kernel(x_ref, scale_ref, shift_ref, o_ref):
    # x_ref: (tile_r, tile_l); scale_ref/shift_ref: (tile_r, 1) f32 columns.
    x = x_ref[...].astype(jnp.float32)
    o_ref[...] = (x * scale_ref[...] + shift_ref[...]).astype(o_ref.dtype)


def _pick_lane_tile(L, bytes_per_elem):
    """Largest multiple-of-128 divisor of L whose 8-row stripe fits the budget.

    If L is not a multiple of 128 the full dimension must be used (the (8,128)
    rule only allows lane tiles that are multiples of 128 or the full dim)."""
    if L % 128 != 0:
        return L
    cap = max(128, (_STEP_BYTES // (8 * bytes_per_elem)) // 128 * 128)
    k = L // 128
    m_max = min(k, cap // 128)
    for m in range(m_max, 0, -1):
        if k % m == 0:
            return 128 * m
    return 128


def _pick_row_tile(R, max_rows):
    """Multiple-of-8 row tile <= R; Pallas masks the remainder block.

    The full (possibly < 8) dimension is only used when R itself is tiny."""
    if R <= 8:
        return R
    return max(8, min(max_rows, (R // 8) * 8))


def frozen_batch_norm_2d(x, weight, bias, running_mean, running_var, eps=1e-5):
    """y = (x - running_mean) / sqrt(running_var + eps) * weight + bias.

    x: (N, C, H, W).  weight/bias/running_mean/running_var: (C,).
    Matches F.batch_norm(..., training=False) / FrozenBatchNorm2d forward.
    """
    N, C, H, W = x.shape
    R = N * C
    L = H * W

    # Hoisted per-channel affine, computed once in f32.
    scale = (weight.astype(jnp.float32)
             * lax.rsqrt(running_var.astype(jnp.float32) + jnp.float32(eps)))
    shift = bias.astype(jnp.float32) - running_mean.astype(jnp.float32) * scale

    # Per-row column vectors for the flattened (N*C, H*W) view.
    scale_col = jnp.broadcast_to(scale[None, :], (N, C)).reshape(R, 1)
    shift_col = jnp.broadcast_to(shift[None, :], (N, C)).reshape(R, 1)

    x2 = x.reshape(R, L)

    in_bytes = x.dtype.itemsize
    out_bytes = in_bytes
    bytes_per_elem = in_bytes + out_bytes

    # Lane tile: lane-dense (multiple-of-128 divisor of L), or full L if L is
    # not a multiple of 128.
    tile_l = _pick_lane_tile(L, bytes_per_elem)

    # Byte-accurate row budget: VMEM stores each row padded to 128 lanes.
    padded_l = _round_up(tile_l, 128)
    bytes_per_row = padded_l * bytes_per_elem
    max_rows = max(8, (_STEP_BYTES // max(bytes_per_row, 1)) // 8 * 8)
    tile_r = _pick_row_tile(R, max_rows)

    nr = _cdiv(R, tile_r)
    nl = _cdiv(L, tile_l)

    # v7x has two TensorCores; when the lane axis collapses to a single block,
    # nudge the row axis to an even (>=2) block count so both cores get work.
    if nl == 1 and R >= 16 and nr % 2 == 1:
        cand = min(tile_r, max(8, _round_up(_cdiv(R, nr + 1), 8)))
        if _cdiv(R, cand) % 2 == 0:
            tile_r = cand
            nr = _cdiv(R, tile_r)

    grid = (nr, nl)

    cost = pl.CostEstimate(
        flops=2 * R * L,
        transcendentals=0,
        bytes_accessed=R * L * bytes_per_elem + 2 * R * 4,
    )

    out2 = pl.pallas_call(
        _frozen_bn_kernel,
        out_shape=jax.ShapeDtypeStruct((R, L), x.dtype),
        grid_spec=pltpu.PrefetchScalarGridSpec(
            num_scalar_prefetch=0,
            grid=grid,
            in_specs=[
                pl.BlockSpec((tile_r, tile_l), lambda r, l: (r, l)),
                pl.BlockSpec((tile_r, 1), lambda r, l: (r, 0)),
                pl.BlockSpec((tile_r, 1), lambda r, l: (r, 0)),
            ],
            out_specs=pl.BlockSpec((tile_r, tile_l), lambda r, l: (r, l)),
        ),
        compiler_params=pltpu.CompilerParams(
            dimension_semantics=("parallel", "parallel"),
            vmem_limit_bytes=_VMEM_LIMIT_BYTES,
        ),
        cost_estimate=cost,
    )(x2, scale_col, shift_col)

    return out2.reshape(N, C, H, W)


if __name__ == "__main__":
    key = jax.random.PRNGKey(0)
    kx, kw, kb, km, kv = jax.random.split(key, 5)

    N, C, H, W = 2, 4, 16, 16
    eps = 1e-5

    x = jax.random.normal(kx, (N, C, H, W), dtype=jnp.float32)

    # Deterministic synthetic buffers (module buffers have shape (C,)).
    weight = 1.0 + 0.1 * jax.random.normal(kw, (C,), dtype=jnp.float32)
    bias = 0.1 * jax.random.normal(kb, (C,), dtype=jnp.float32)
    running_mean = 0.5 * jax.random.normal(km, (C,), dtype=jnp.float32)
    running_var = jnp.abs(jax.random.normal(kv, (C,), dtype=jnp.float32)) + 0.5

    out = frozen_batch_norm_2d(x, weight, bias, running_mean, running_var, eps=eps)
    out = jax.block_until_ready(out)

    # Pure-JAX reference (F.batch_norm, training=False semantics).
    scale_ref = weight * lax.rsqrt(running_var + eps)
    shift_ref = bias - running_mean * scale_ref
    ref = x * scale_ref.reshape(1, C, 1, 1) + shift_ref.reshape(1, C, 1, 1)

    assert out.shape == x.shape and out.dtype == x.dtype
    assert jnp.allclose(out, ref, atol=1e-5, rtol=1e-5)

    print("KERNEL_OK")
</pallas_src>

<mosaic_0001>
module attributes {stable_mosaic.version = 11 : i64} {
  func.func @_frozen_bn_kernel(%arg0: i32, %arg1: i32, %arg2: memref<8x256xf32, #tpu.memory_space<vmem>>, %arg3: memref<8x1xf32, #tpu.memory_space<vmem>>, %arg4: memref<8x1xf32, #tpu.memory_space<vmem>>, %arg5: memref<8x256xf32, #tpu.memory_space<vmem>>) attributes {dimension_semantics = [#tpu.dimension_semantics<parallel>, #tpu.dimension_semantics<parallel>], iteration_bounds = array<i64: 1, 1>, scalar_prefetch = 0 : i64, scratch_operands = 0 : i64, tpu.core_type = #tpu.core_type<tc>, window_params = [{transform_indices = @transform_0, window_bounds = array<i64: 8, 256>}, {transform_indices = @transform_1, window_bounds = array<i64: 8, 1>}, {transform_indices = @transform_2, window_bounds = array<i64: 8, 1>}, {transform_indices = @transform_3, window_bounds = array<i64: 8, 256>}]} {
    %c0 = arith.constant 0 : index
    %c0_0 = arith.constant 0 : index
    %0 = vector.load %arg2[%c0, %c0_0] : memref<8x256xf32, #tpu.memory_space<vmem>>, vector<8x256xf32>
    %c0_1 = arith.constant 0 : index
    %c0_2 = arith.constant 0 : index
    %1 = vector.load %arg3[%c0_1, %c0_2] : memref<8x1xf32, #tpu.memory_space<vmem>>, vector<8x1xf32>
    %2 = vector.broadcast %1 : vector<8x1xf32> to vector<8x256xf32>
    %3 = arith.mulf %0, %2 : vector<8x256xf32>
    %c0_3 = arith.constant 0 : index
    %c0_4 = arith.constant 0 : index
    %4 = vector.load %arg4[%c0_3, %c0_4] : memref<8x1xf32, #tpu.memory_space<vmem>>, vector<8x1xf32>
    %5 = vector.broadcast %4 : vector<8x1xf32> to vector<8x256xf32>
    %6 = arith.addf %3, %5 : vector<8x256xf32>
    %c0_5 = arith.constant 0 : index
    %c0_6 = arith.constant 0 : index
    %7 = vector.load %arg5[%c0_5, %c0_6] : memref<8x256xf32, #tpu.memory_space<vmem>>, vector<8x256xf32>
    tpu.vector_store %arg5[%c0_5, %c0_6], %6 {strides = array<i32>} : memref<8x256xf32, #tpu.memory_space<vmem>>, vector<8x256xf32>,
    return
  }
  func.func @transform_0(%arg0: i32, %arg1: i32) -> (i32, i32) {
    %c0_i32 = arith.constant 0 : i32
    return %arg0, %arg1 : i32, i32
  }
  func.func @transform_1(%arg0: i32, %arg1: i32) -> (i32, i32) {
    %c0_i32 = arith.constant 0 : i32
    %c0_i32_0 = arith.constant 0 : i32
    return %arg0, %c0_i32 : i32, i32
  }
  func.func @transform_2(%arg0: i32, %arg1: i32) -> (i32, i32) {
    %c0_i32 = arith.constant 0 : i32
    %c0_i32_0 = arith.constant 0 : i32
    return %arg0, %c0_i32 : i32, i32
  }
  func.func @transform_3(%arg0: i32, %arg1: i32) -> (i32, i32) {
    %c0_i32 = arith.constant 0 : i32
    return %arg0, %arg1 : i32, i32
  }
}

</mosaic_0001>

<bundles_post_ra>
// kernel: tpu_custom_call.1
= control target key start
LH: loop header
LB: loop body
LE: loop exit
PB: predicated region body
PF: predicated region fallthrough
CT: control target
= control target key end

     0   :  { %s122_s0 = inlined_call_operand.vmem [shape: f32[8,256], index: 0, kind: input, shape index: {}]   ;;  %s123_s1 = inlined_call_operand.vmem [shape: f32[8,1], index: 1, kind: input, shape index: {}]   ;;  %s124_s2 = inlined_call_operand.vmem [shape: f32[8,1], index: 2, kind: input, shape index: {}]   ;;  %s125_s3 = inlined_call_operand.hbm [shape: f32[8,256], index: 3, kind: output, shape index: {}]  }
   0x1   :  { %v17_v0 = vld [vmem:[%s123_s1] sm:$0xff] }
   0x2   :  { %8 = vsyncpa [#allocation3], 0  ;;  %v76_v1 = vmov 0   ;;  %v25_v2 = vld [vmem:[%s124_s2] sm:$0xff]  ;;  %v16_v5 = vld [vmem:[%s122_s0 + $0x8] sm:$0xff]  ;;  %s77_s20 = smov [#allocation2]  }
   0x3   :  { %51 = vset.pattern.permute.xlu0 %v76_v1  ;;  %v15_v4 = vld [vmem:[%s122_s0] sm:$0xff]  ;;  %s41_s1 = sshll.u32 %s77_s20, 4  ;;  %s42_s1 = int_to_ptr.vmem [resolvable:$true] %s41_s1 }
   0x4   :  { %20 = vperm.xlu0 %51, %v17_v0   ;;  %s52_s2 = scalar_lea.vmem %s42_s1, 256  ;;  %p57_p1 = scmp.lt.s32.totalorder %s42_s1, %s42_s1 }
   0x5   :  { %p53_p0 = scmp.ne.s32.totalorder %s42_s1, %s52_s2  ;;  %p58_p2 = scmp.lt.s32.totalorder %s52_s2, %s52_s2 }
   0x7   :  { %p59_p3 = por %p58_p2, %p57_p1 }
   0x8   :  { %28 = vperm.xlu0 %51, %v25_v2  }
   0x9   :  { %p60_p4 = pnand %p59_p3, %p53_p0 }
  0x83   :  { %v21_v3 = vpop.permute.xlu0 %20 }
  0x84   :  { %v23_v6 = vmul.f32 %v21_v3, %v15_v4  ;;  %v24_v7 = vmul.f32 %v21_v3, %v16_v5 }
  0x87   :  { %v29_v8 = vpop.permute.xlu0 %28 }
  0x88   :  { %v31_v9 = vadd.f32 %v29_v8, %v23_v6  ;;  %v32_v10 = vadd.f32 %v29_v8, %v24_v7 }
  0x8a   :  { %33 = vst [vmem:[#allocation2] sm:$0xff] %v31_v9  ;;  %34 = vst [vmem:[#allocation2 + $0x8] sm:$0xff] %v32_v10 }
  0x8b   :  { %63 = shalt.err (!%p60_p4)
}
  0x8c   :  { %s64_s0 = scalar_lea.hbm %s125_s3, 256 }
  0x8d   :  { %p65_p5 = scmp.ne.s32.totalorder %s125_s3, %s64_s0  ;;  %p68_p6 = scmp.lt.u32.totalorder %s64_s0, %s125_s3 }
  0x8f   :  { %p70_p7 = pnand %p68_p6, %p65_p5 }
  0x91   :  { %73 = shalt.err (!%p70_p7)
}
  0x92   :  { %44 = dma.vmem_to_hbm [thread:$0]  %s42_s1, 256, %s125_s3, [#allocation3]  }
  0x93   :  { %74 = dma.done.wait [#allocation3], 256  }
  0x94   :  { %75 = vsyncadd [#allocation3], 4294967040 }
  0x95   :  { %48 = vsyncpa [#allocation3], 1 }

</bundles_post_ra>
